<compile_context>
chip_gen: v5e
topology: v5e:2x2
jax: 0.10.0
libtpu: 0.0.40
codegen_flags: <defaults>
</compile_context>

<pallas_src>
import functools

import jax
import jax.numpy as jnp
from jax.experimental import pallas as pl
from jax.experimental.pallas import tpu as pltpu

LANE = 128                       # lane width / channel padding granularity
TM_MAX = 512                     # output row tile (big tiles: ~85% HBM roofline)
_VMEM_BUDGET = 40 * 1024 * 1024  # gate for resident slabs (fits v7x 64 MiB VMEM)
_VMEM_LIMIT = 48 * 1024 * 1024   # scoped VMEM limit for the aggregation call


def _round_up(x, m):
    return ((x + m - 1) // m) * m


def _pad2(x, rows, cols):
    r, c = x.shape
    return jnp.pad(x, ((0, rows - r), (0, cols - c)))


# -----------------------------------------------------------------------------
# Pallas kernels
# -----------------------------------------------------------------------------
def _transform_kernel(x_ref, w_ref, o_ref):
    # XW = X @ W : bf16 MXU inputs (pre-cast on host / previous layer), f32 acc.
    o_ref[...] = jnp.dot(
        x_ref[...], w_ref[...], preferred_element_type=jnp.float32
    ).astype(o_ref.dtype)


def _agg_collapsed_kernel(a_ref, xw_ref, b_ref, o_ref, *, apply_relu):
    # One row-slab of A_hat against the full (VMEM-resident) XW.
    y = jnp.dot(a_ref[...], xw_ref[...], preferred_element_type=jnp.float32)
    y = y + b_ref[...]
    if apply_relu:
        y = jnp.maximum(y, 0.0)
    o_ref[...] = y.astype(o_ref.dtype)


def _agg_ktiled_kernel(a_ref, xw_ref, b_ref, o_ref, acc_ref, *,
                       apply_relu, tk, xw_resident):
    # k-tiled fallback: f32 accumulator, bias/ReLU epilogue at last k.
    k = pl.program_id(1)

    @pl.when(k == 0)
    def _():
        acc_ref[...] = jnp.zeros_like(acc_ref)

    if xw_resident:
        off = pl.multiple_of(k * tk, 128)
        xw = xw_ref[pl.ds(off, tk), :]
    else:
        xw = xw_ref[...]
    acc_ref[...] += jnp.dot(a_ref[...], xw, preferred_element_type=jnp.float32)

    @pl.when(k == pl.num_programs(1) - 1)
    def _():
        y = acc_ref[...] + b_ref[...]
        if apply_relu:
            y = jnp.maximum(y, 0.0)
        o_ref[...] = y.astype(o_ref.dtype)


def _pool_lin_kernel(p_ref, h_ref, w_ref, b_ref, o_ref, acc_ref):
    # global_mean_pool (rows of P hold 1/|graph|) tiled over N, then Linear.
    k = pl.program_id(0)

    @pl.when(k == 0)
    def _():
        acc_ref[...] = jnp.zeros_like(acc_ref)

    acc_ref[...] += jnp.dot(p_ref[...], h_ref[...],
                            preferred_element_type=jnp.float32)

    @pl.when(k == pl.num_programs(0) - 1)
    def _():
        o_ref[...] = (
            jnp.dot(acc_ref[...], w_ref[...], preferred_element_type=jnp.float32)
            + b_ref[...]
        ).astype(o_ref.dtype)


# -----------------------------------------------------------------------------
# pallas_call wrappers
# -----------------------------------------------------------------------------
def feature_transform(h_bf16, w_bf16):
    n_pad, c_in = h_bf16.shape
    c_out = w_bf16.shape[1]
    tm = min(TM_MAX, n_pad)
    return pl.pallas_call(
        _transform_kernel,
        out_shape=jax.ShapeDtypeStruct((n_pad, c_out), jnp.bfloat16),
        grid_spec=pltpu.PrefetchScalarGridSpec(
            num_scalar_prefetch=0,
            grid=(n_pad // tm,),
            in_specs=[
                pl.BlockSpec((tm, c_in), lambda i: (i, 0)),
                pl.BlockSpec((c_in, c_out), lambda i: (0, 0)),
            ],
            out_specs=pl.BlockSpec((tm, c_out), lambda i: (i, 0)),
        ),
        compiler_params=pltpu.CompilerParams(dimension_semantics=("parallel",)),
        cost_estimate=pl.CostEstimate(
            flops=2 * n_pad * c_in * c_out,
            transcendentals=0,
            bytes_accessed=n_pad * c_in * 2 + c_in * c_out * 2 + n_pad * c_out * 2,
        ),
    )(h_bf16, w_bf16)


def aggregate(a_bf16, xw_bf16, b_row, *, apply_relu, out_dtype):
    n_pad = a_bf16.shape[0]
    c_out = xw_bf16.shape[1]
    tm = min(TM_MAX, n_pad)
    out_bytes = jnp.dtype(out_dtype).itemsize

    cost = pl.CostEstimate(
        flops=2 * n_pad * n_pad * c_out,
        transcendentals=0,
        bytes_accessed=n_pad * n_pad * 2
        + n_pad * c_out * 2
        + n_pad * c_out * out_bytes
        + c_out * 4,
    )
    cparams = dict(vmem_limit_bytes=_VMEM_LIMIT)

    # --- preferred path: collapsed reduction axis (A row slab + resident XW) ---
    collapsed_bytes = (
        2 * tm * n_pad * 2          # double-buffered A row slab (bf16)
        + 2 * n_pad * c_out * 2     # resident XW (bf16, buffer pair)
        + 2 * tm * c_out * out_bytes
        + c_out * 4
    )
    if collapsed_bytes <= _VMEM_BUDGET:
        kernel = functools.partial(_agg_collapsed_kernel, apply_relu=apply_relu)
        return pl.pallas_call(
            kernel,
            out_shape=jax.ShapeDtypeStruct((n_pad, c_out), out_dtype),
            grid_spec=pltpu.PrefetchScalarGridSpec(
                num_scalar_prefetch=0,
                grid=(n_pad // tm,),
                in_specs=[
                    pl.BlockSpec((tm, n_pad), lambda i: (i, 0)),     # A_hat slab
                    pl.BlockSpec((n_pad, c_out), lambda i: (0, 0)),  # XW resident
                    pl.BlockSpec((1, c_out), lambda i: (0, 0)),      # bias row
                ],
                out_specs=pl.BlockSpec((tm, c_out), lambda i: (i, 0)),
            ),
            compiler_params=pltpu.CompilerParams(
                dimension_semantics=("parallel",), **cparams),
            cost_estimate=cost,
        )(a_bf16, xw_bf16, b_row)

    # --- fallback: k-tiled accumulator; keep XW resident in VMEM if it fits ---
    tk = tm
    for cand in (2048, 1024, 512):
        if cand <= n_pad and n_pad % cand == 0:
            tk = cand
            break
    xw_resident = (2 * n_pad * c_out * 2) <= (_VMEM_BUDGET // 2)

    kernel = functools.partial(
        _agg_ktiled_kernel, apply_relu=apply_relu, tk=tk, xw_resident=xw_resident)
    if xw_resident:
        xw_spec = pl.BlockSpec((n_pad, c_out), lambda i, k: (0, 0))
    else:
        xw_spec = pl.BlockSpec((tk, c_out), lambda i, k: (k, 0))

    return pl.pallas_call(
        kernel,
        out_shape=jax.ShapeDtypeStruct((n_pad, c_out), out_dtype),
        grid_spec=pltpu.PrefetchScalarGridSpec(
            num_scalar_prefetch=0,
            grid=(n_pad // tm, n_pad // tk),            # reduction axis last
            in_specs=[
                pl.BlockSpec((tm, tk), lambda i, k: (i, k)),   # A_hat tile
                xw_spec,                                        # XW
                pl.BlockSpec((1, c_out), lambda i, k: (0, 0)),  # bias row
            ],
            out_specs=pl.BlockSpec((tm, c_out), lambda i, k: (i, 0)),
            scratch_shapes=[pltpu.VMEM((tm, c_out), jnp.float32)],
        ),
        compiler_params=pltpu.CompilerParams(
            dimension_semantics=("parallel", "arbitrary"), **cparams),
        cost_estimate=cost,
    )(a_bf16, xw_bf16, b_row)


def gcn_layer(a_bf16, h_bf16, w_bf16, b_row, *, apply_relu, out_dtype):
    xw = feature_transform(h_bf16, w_bf16)
    return aggregate(a_bf16, xw, b_row, apply_relu=apply_relu, out_dtype=out_dtype)


def pool_and_linear(pool_pad, h_f32, w_pad, b_row):
    g_pad, n_pad = pool_pad.shape
    h1_p = h_f32.shape[1]
    cls_p = w_pad.shape[1]
    tkp = 128
    for cand in (2048, 1024, 512, 256, 128):
        if cand <= n_pad and n_pad % cand == 0:
            tkp = cand
            break
    return pl.pallas_call(
        _pool_lin_kernel,
        out_shape=jax.ShapeDtypeStruct((g_pad, cls_p), jnp.float32),
        grid_spec=pltpu.PrefetchScalarGridSpec(
            num_scalar_prefetch=0,
            grid=(n_pad // tkp,),
            in_specs=[
                pl.BlockSpec((g_pad, tkp), lambda k: (0, k)),   # pool tile
                pl.BlockSpec((tkp, h1_p), lambda k: (k, 0)),    # H tile
                pl.BlockSpec((h1_p, cls_p), lambda k: (0, 0)),  # Linear weight
                pl.BlockSpec((1, cls_p), lambda k: (0, 0)),     # Linear bias
            ],
            out_specs=pl.BlockSpec((g_pad, cls_p), lambda k: (0, 0)),
            scratch_shapes=[pltpu.VMEM((g_pad, h1_p), jnp.float32)],
        ),
        compiler_params=pltpu.CompilerParams(dimension_semantics=("arbitrary",)),
    )(pool_pad, h_f32, w_pad, b_row)


# -----------------------------------------------------------------------------
# Plain-JAX glue: normalized adjacency, pooling matrix, params, forward
# -----------------------------------------------------------------------------
def normalized_adjacency(edge_index, num_nodes):
    src, dst = edge_index[0], edge_index[1]
    a = jnp.zeros((num_nodes, num_nodes), jnp.float32).at[dst, src].set(1.0)
    idx = jnp.arange(num_nodes)
    a = a.at[idx, idx].set(1.0)        # add_remaining_self_loops semantics
    deg = a.sum(axis=1)
    dinv = jnp.where(deg > 0, jax.lax.rsqrt(deg), 0.0)
    return dinv[:, None] * a * dinv[None, :]


def mean_pool_matrix(batch, num_graphs, num_nodes):
    onehot = (batch[None, :] == jnp.arange(num_graphs)[:, None]).astype(jnp.float32)
    counts = jnp.maximum(onehot.sum(axis=1, keepdims=True), 1.0)
    return onehot / counts                                   # [G, N]


def glorot(key, shape):
    fan_in, fan_out = shape
    limit = jnp.sqrt(6.0 / (fan_in + fan_out))
    return jax.random.uniform(key, shape, jnp.float32, -limit, limit)


def init_params(key, in_channels, hidden_base, num_classes):
    h8, h4, h1 = hidden_base * 8, hidden_base * 4, hidden_base
    ks = jax.random.split(key, 8)
    return {
        "w1": glorot(ks[0], (in_channels, h8)), "b1": jnp.zeros((h8,), jnp.float32),
        "w2": glorot(ks[1], (h8, h4)),          "b2": jnp.zeros((h4,), jnp.float32),
        "w3": glorot(ks[2], (h4, h1)),          "b3": jnp.zeros((h1,), jnp.float32),
        "w_lin": glorot(ks[3], (h1, num_classes)),
        "b_lin": jax.random.uniform(ks[4], (num_classes,), jnp.float32,
                                    -1.0 / jnp.sqrt(h1), 1.0 / jnp.sqrt(h1)),
    }


def gcn_forward(params, x, edge_index, batch, num_graphs):
    n, c_in = x.shape
    num_classes = params["w_lin"].shape[1]

    # padded geometry: lane-dense channels, size-adaptive node padding
    n_pad = _round_up(n, LANE) if n <= TM_MAX else _round_up(n, TM_MAX)
    c_in_p = _round_up(c_in, LANE)
    h8_p = _round_up(params["w1"].shape[1], LANE)
    h4_p = _round_up(params["w2"].shape[1], LANE)
    h1_p = _round_up(params["w3"].shape[1], LANE)
    cls_p = _round_up(num_classes, LANE)
    g_pad = _round_up(num_graphs, 8)

    # dense graph operators (A_hat bf16: dominant HBM stream, values in [0,1])
    a_pad = _pad2(normalized_adjacency(edge_index, n), n_pad, n_pad).astype(jnp.bfloat16)
    pool_pad = _pad2(mean_pool_matrix(batch, num_graphs, n), g_pad, n_pad)

    x_pad = _pad2(x, n_pad, c_in_p).astype(jnp.bfloat16)

    # zero-padded parameters (padding is exact: extra rows/cols contribute 0)
    w1 = _pad2(params["w1"], c_in_p, h8_p).astype(jnp.bfloat16)
    b1 = jnp.pad(params["b1"], (0, h8_p - params["b1"].shape[0])).reshape(1, h8_p)
    w2 = _pad2(params["w2"], h8_p, h4_p).astype(jnp.bfloat16)
    b2 = jnp.pad(params["b2"], (0, h4_p - params["b2"].shape[0])).reshape(1, h4_p)
    w3 = _pad2(params["w3"], h4_p, h1_p).astype(jnp.bfloat16)
    b3 = jnp.pad(params["b3"], (0, h1_p - params["b3"].shape[0])).reshape(1, h1_p)
    w_lin = _pad2(params["w_lin"], h1_p, cls_p)
    b_lin = jnp.pad(params["b_lin"], (0, cls_p - params["b_lin"].shape[0])).reshape(1, cls_p)

    # conv1 -> relu  (dropout p=0.3 is identity in eval mode -> omitted)
    h = gcn_layer(a_pad, x_pad, w1, b1, apply_relu=True, out_dtype=jnp.bfloat16)
    # conv2 -> relu
    h = gcn_layer(a_pad, h, w2, b2, apply_relu=True, out_dtype=jnp.bfloat16)
    # conv3 (no relu in reference); keep f32 into the pool/Linear readout
    h = gcn_layer(a_pad, h, w3, b3, apply_relu=False, out_dtype=jnp.float32)
    # global_mean_pool + Linear, then strip padding
    out_pad = pool_and_linear(pool_pad, h, w_lin, b_lin)
    return out_pad[:num_graphs, :num_classes]


# -----------------------------------------------------------------------------
# Example
# -----------------------------------------------------------------------------
if __name__ == "__main__":
    key = jax.random.PRNGKey(0)
    in_channels, hidden_base, num_classes = 4, 8, 3
    num_nodes, num_graphs = 16, 2

    k_x, k_p = jax.random.split(key)
    x = jax.random.normal(k_x, (num_nodes, in_channels), jnp.float32)

    # two small graphs: nodes 0..8 (ring of 9, graph 0) and 9..15 (ring of 7, graph 1)
    def ring_edges(start, count):
        src = jnp.arange(start, start + count)
        dst = jnp.concatenate([jnp.arange(start + 1, start + count),
                               jnp.array([start])])
        return src, dst

    s0, d0 = ring_edges(0, 9)
    s1, d1 = ring_edges(9, 7)
    src = jnp.concatenate([s0, s1])
    dst = jnp.concatenate([d0, d1])
    # undirected: add both directions
    edge_index = jnp.stack([jnp.concatenate([src, dst]),
                            jnp.concatenate([dst, src])]).astype(jnp.int32)
    batch = jnp.concatenate([jnp.zeros((9,), jnp.int32),
                             jnp.ones((7,), jnp.int32)])

    params = init_params(k_p, in_channels, hidden_base, num_classes)

    out = gcn_forward(params, x, edge_index, batch, num_graphs)
    out = jax.block_until_ready(out)
    assert out.shape == (num_graphs, num_classes)
    assert jnp.all(jnp.isfinite(out))
    print("KERNEL_OK")
</pallas_src>

<mosaic_0001>
module attributes {stable_mosaic.version = 11 : i64} {
  func.func @_transform_kernel(%arg0: i32, %arg1: memref<128x128xbf16, #tpu.memory_space<vmem>>, %arg2: memref<128x128xbf16, #tpu.memory_space<vmem>>, %arg3: memref<128x128xbf16, #tpu.memory_space<vmem>>) attributes {dimension_semantics = [#tpu.dimension_semantics<parallel>], iteration_bounds = array<i64: 1>, scalar_prefetch = 0 : i64, scratch_operands = 0 : i64, tpu.core_type = #tpu.core_type<tc>, window_params = [{transform_indices = @transform_0, window_bounds = array<i64: 128, 128>}, {pipeline_mode = #tpu.pipeline_mode<synchronous>, transform_indices = @transform_1, window_bounds = array<i64: 128, 128>}, {transform_indices = @transform_2, window_bounds = array<i64: 128, 128>}]} {
    %c0 = arith.constant 0 : index
    %c0_0 = arith.constant 0 : index
    %0 = vector.load %arg1[%c0, %c0_0] : memref<128x128xbf16, #tpu.memory_space<vmem>>, vector<128x128xbf16>
    %c0_1 = arith.constant 0 : index
    %c0_2 = arith.constant 0 : index
    %1 = vector.load %arg2[%c0_1, %c0_2] : memref<128x128xbf16, #tpu.memory_space<vmem>>, vector<128x128xbf16>
    %cst = arith.constant dense<0.000000e+00> : vector<128x128xf32>
    %2 = tpu.matmul %0, %1, %cst {dimension_numbers = #tpu.dot_dimension_numbers<[1], [0], [0], [1], [0, 0, 1, 1], [], []>} : vector<128x128xbf16>, vector<128x128xbf16>, vector<128x128xf32> -> vector<128x128xf32>
    %3 = arith.truncf %2 : vector<128x128xf32> to vector<128x128xbf16>
    %c0_3 = arith.constant 0 : index
    %c0_4 = arith.constant 0 : index
    %4 = vector.load %arg3[%c0_3, %c0_4] : memref<128x128xbf16, #tpu.memory_space<vmem>>, vector<128x128xbf16>
    tpu.vector_store %arg3[%c0_3, %c0_4], %3 {strides = array<i32>} : memref<128x128xbf16, #tpu.memory_space<vmem>>, vector<128x128xbf16>,
    return
  }
  func.func @transform_0(%arg0: i32) -> (i32, i32) {
    %c0_i32 = arith.constant 0 : i32
    %c0_i32_0 = arith.constant 0 : i32
    return %arg0, %c0_i32 : i32, i32
  }
  func.func @transform_1(%arg0: i32) -> (i32, i32) {
    %c0_i32 = arith.constant 0 : i32
    %c0_i32_0 = arith.constant 0 : i32
    %c0_i32_1 = arith.constant 0 : i32
    return %c0_i32, %c0_i32_0 : i32, i32
  }
  func.func @transform_2(%arg0: i32) -> (i32, i32) {
    %c0_i32 = arith.constant 0 : i32
    %c0_i32_0 = arith.constant 0 : i32
    return %arg0, %c0_i32 : i32, i32
  }
}

</mosaic_0001>

<bundles_post_ra>
// kernel: tpu_custom_call.1
= control target key start
LH: loop header
LB: loop body
LE: loop exit
PB: predicated region body
PF: predicated region fallthrough
CT: control target
= control target key end

     0   :  { %7 = vsyncpa [#allocation3], 0  ;;  %s545_s0 = inlined_call_operand.hbm [shape: bf16[128,128], index: 0, kind: input, shape index: {}]   ;;  %s546_s1 = inlined_call_operand.hbm [shape: bf16[128,128], index: 1, kind: input, shape index: {}]   ;;  %s547_s2 = inlined_call_operand.hbm [shape: bf16[128,128], index: 2, kind: output, shape index: {}]  }
   0x1   :  { %8 = vsyncpa [#allocation6], 0 }
   0x2   :  { %9 = vsyncpa [#allocation4], 0  ;;  %s14_s11 = sshll.u32 %s545_s0, 4  ;;  %s507_s12 = smov [#allocation2]   ;;  %s15_s11 = int_to_ptr.hbm [resolvable:$true] %s14_s11 }
   0x3   :  { %s16_s13 = sshll.u32 %s507_s12, 4  ;;  %s27_s16 = sshll.u32 %s546_s1, 4  ;;  %s17_s13 = int_to_ptr.vmem [resolvable:$true] %s16_s13  ;;  %s28_s16 = int_to_ptr.hbm [resolvable:$true] %s27_s16 }
   0x4   :  { %s508_s17 = smov 64   ;;  %s509_s18 = smov 4  }
   0x5   :  { %22 = dma.hbm_to_vmem [thread:$0]  %s15_s11, 1024, %s17_s13, [#allocation3], %s508_s17, %s508_s17, %s509_s18  }
   0x6   :  { %s510_s19 = smov [#allocation5]  }
   0x7   :  { %s29_s20 = sshll.u32 %s510_s19, 4  ;;  %s30_s20 = int_to_ptr.vmem [resolvable:$true] %s29_s20 }
   0x8   :  { %35 = dma.hbm_to_vmem [thread:$0]  %s28_s16, 1024, %s30_s20, [#allocation6], %s508_s17, %s508_s17, %s509_s18  }
   0x9   :  { %501 = dma.done.wait [#allocation3], 1024  }
   0xa   :  { %502 = vsyncadd [#allocation3], 4294966272 }
   0xb   :  { %503 = dma.done.wait [#allocation6], 1024  }
   0xc   :  { %504 = vsyncadd [#allocation6], 4294966272  ;;  %v352_v0 = vld [vmem:[#allocation5 + $0x38] sm:$0xff]  ;;  %v351_v1 = vld [vmem:[#allocation5 + $0x30] sm:$0xff]  ;;  %s511_s0 = smov [#allocation7]   ;;  %s259_s23 = sshll.u32 %s547_s2, 4  ;;  %s260_s23 = int_to_ptr.hbm [resolvable:$true] %s259_s23 }
   0xd   :  { %172 = vmatpush.bf16.msra.mxu0 %v352_v0  ;;  %400 = vmatpush.bf16.msra.mxu1 %v352_v0  ;;  %v350_v2 = vld [vmem:[#allocation5 + $0x28] sm:$0xff]  ;;  %v349_v3 = vld [vmem:[#allocation5 + $0x20] sm:$0xff]  ;;  %v348_v4 = vld [vmem:[#allocation5 + $0x18] sm:$0xff]  ;;  %s257_s1 = sshll.u32 %s511_s0, 4  ;;  %s258_s1 = int_to_ptr.vmem [resolvable:$true] %s257_s1 }
   0xe   :  { %401 = vmatpush.bf16.msra.mxu2 %v352_v0  ;;  %402 = vmatpush.bf16.msra.mxu3 %v352_v0  ;;  %v347_v5 = vld [vmem:[#allocation5 + $0x10] sm:$0xff]  ;;  %v346_v6 = vld [vmem:[#allocation5 + $0x8] sm:$0xff]  ;;  %v345_v7 = vld [vmem:[#allocation5] sm:$0xff] }
   0xf   :  { %v337_v8 = vld [vmem:[#allocation2] sm:$0xff]  ;;  %v339_v9 = vld [vmem:[#allocation2 + $0x10] sm:$0xff]  ;;  %v338_v12 = vld [vmem:[#allocation2 + $0x8] sm:$0xff] }
  0x10   :  { %v341_v10 = vld [vmem:[#allocation2 + $0x20] sm:$0xff]  ;;  %v343_v11 = vld [vmem:[#allocation2 + $0x30] sm:$0xff]  ;;  %v340_v13 = vld [vmem:[#allocation2 + $0x18] sm:$0xff] }
  0x11   :  { %173 = vmatpush.bf16.msra.mxu0 %v351_v1  ;;  %403 = vmatpush.bf16.msra.mxu1 %v351_v1  ;;  %v342_v14 = vld [vmem:[#allocation2 + $0x28] sm:$0xff]  ;;  %v344_v15 = vld [vmem:[#allocation2 + $0x38] sm:$0xff] }
  0x12   :  { %404 = vmatpush.bf16.msra.mxu2 %v351_v1  ;;  %405 = vmatpush.bf16.msra.mxu3 %v351_v1 }
  0x15   :  { %174 = vmatpush.bf16.msra.mxu0 %v350_v2  ;;  %406 = vmatpush.bf16.msra.mxu1 %v350_v2 }
  0x16   :  { %407 = vmatpush.bf16.msra.mxu2 %v350_v2  ;;  %408 = vmatpush.bf16.msra.mxu3 %v350_v2 }
  0x19   :  { %175 = vmatpush.bf16.msra.mxu0 %v349_v3  ;;  %409 = vmatpush.bf16.msra.mxu1 %v349_v3 }
  0x1a   :  { %410 = vmatpush.bf16.msra.mxu2 %v349_v3  ;;  %411 = vmatpush.bf16.msra.mxu3 %v349_v3 }
  0x1d   :  { %176 = vmatpush.bf16.msra.mxu0 %v348_v4  ;;  %412 = vmatpush.bf16.msra.mxu1 %v348_v4 }
  0x1e   :  { %413 = vmatpush.bf16.msra.mxu2 %v348_v4  ;;  %414 = vmatpush.bf16.msra.mxu3 %v348_v4 }
  0x21   :  { %177 = vmatpush.bf16.msra.mxu0 %v347_v5  ;;  %415 = vmatpush.bf16.msra.mxu1 %v347_v5 }
  0x22   :  { %416 = vmatpush.bf16.msra.mxu2 %v347_v5  ;;  %417 = vmatpush.bf16.msra.mxu3 %v347_v5 }
  0x25   :  { %178 = vmatpush.bf16.msra.mxu0 %v346_v6  ;;  %418 = vmatpush.bf16.msra.mxu1 %v346_v6 }
  0x26   :  { %419 = vmatpush.bf16.msra.mxu2 %v346_v6  ;;  %420 = vmatpush.bf16.msra.mxu3 %v346_v6 }
  0x29   :  { %179 = vmatpush.bf16.msra.mxu0 %v345_v7  ;;  %421 = vmatpush.bf16.msra.mxu1 %v345_v7 }
  0x2a   :  { %422 = vmatpush.bf16.msra.mxu2 %v345_v7  ;;  %423 = vmatpush.bf16.msra.mxu3 %v345_v7 }
  0x2c   :  { %180 = vmatmul.bf16.vlgmr.msra.gmra.mxu0 %v337_v8  ;;  %190 = vmatmul.bf16.vlgmr.msra.gmra.mxu1 %v339_v9 }
  0x2d   :  { %200 = vmatmul.bf16.vlgmr.msra.gmra.mxu2 %v341_v10  ;;  %210 = vmatmul.bf16.vlgmr.msra.gmra.mxu3 %v343_v11 }
  0x3c   :  { %185 = vmatmul.bf16.gmra.mxu0 %v338_v12  ;;  %195 = vmatmul.bf16.gmra.mxu1 %v340_v13 }
  0x3d   :  { %205 = vmatmul.bf16.gmra.mxu2 %v342_v14  ;;  %215 = vmatmul.bf16.gmra.mxu3 %v344_v15 }
  0xa9   :  { %v181_v16 = vpop.f32.mrf.mxu0  ;;  %v191_v17 = vpop.f32.mrf.mxu1 }
  0xb0   :  { %v201_v18 = vpop.f32.mrf.mxu2  ;;  %v211_v19 = vpop.f32.mrf.mxu3 }
  0xb1   :  { %v183_v20 = vpop.f32.mrf.mxu0  ;;  %v193_v21 = vpop.f32.mrf.mxu1 }
  0xb2   :  { %v356_v22 = vpack.c.bf16 %v183_v20, %v181_v16  ;;  %v366_v23 = vpack.c.bf16 %v193_v21, %v191_v17 }
  0xb4   :  { %357 = vst [vmem:[#allocation7] sm:$0xff] %v356_v22  }
  0xb5   :  { %394 = vst [vmem:[#allocation7 + $0x10] sm:$0xff] %v366_v23  }
  0xb8   :  { %v203_v24 = vpop.f32.mrf.mxu2  ;;  %v213_v25 = vpop.f32.mrf.mxu3 }
  0xb9   :  { %v376_v26 = vpack.c.bf16 %v203_v24, %v201_v18  ;;  %v386_v27 = vpack.c.bf16 %v213_v25, %v211_v19  ;;  %v186_v28 = vpop.f32.mrf.mxu0  ;;  %v196_v29 = vpop.f32.mrf.mxu1 }
  0xbb   :  { %396 = vst [vmem:[#allocation7 + $0x20] sm:$0xff] %v376_v26  }
  0xbc   :  { %398 = vst [vmem:[#allocation7 + $0x30] sm:$0xff] %v386_v27  }
  0xc0   :  { %v206_v30 = vpop.f32.mrf.mxu2  ;;  %v216_v31 = vpop.f32.mrf.mxu3 }
  0xc1   :  { %v188_v32 = vpop.f32.mrf.mxu0  ;;  %v198_v33 = vpop.f32.mrf.mxu1 }
  0xc2   :  { %v361_v34 = vpack.c.bf16 %v188_v32, %v186_v28  ;;  %v371_v35 = vpack.c.bf16 %v198_v33, %v196_v29 }
  0xc4   :  { %393 = vst [vmem:[#allocation7 + $0x8] sm:$0xff] %v361_v34  }
  0xc5   :  { %395 = vst [vmem:[#allocation7 + $0x18] sm:$0xff] %v371_v35  }
  0xc8   :  { %v208_v36 = vpop.f32.mrf.mxu2  ;;  %v218_v37 = vpop.f32.mrf.mxu3 }
  0xc9   :  { %v381_v38 = vpack.c.bf16 %v208_v36, %v206_v30  ;;  %v391_v39 = vpack.c.bf16 %v218_v37, %v216_v31 }
  0xcb   :  { %397 = vst [vmem:[#allocation7 + $0x28] sm:$0xff] %v381_v38  }
  0xcc   :  { %399 = vst [vmem:[#allocation7 + $0x38] sm:$0xff] %v391_v39  }
  0xcd   :  { %265 = dma.vmem_to_hbm [thread:$0]  %s258_s1, 1024, %s260_s23, [#allocation4], %s508_s17, %s508_s17, %s509_s18  }
  0xce   :  { %505 = dma.done.wait [#allocation4], 1024  }
  0xcf   :  { %506 = vsyncadd [#allocation4], 4294966272 }
  0xd0   :  { %270 = vsyncpa [#allocation3], 1 }
  0xd1   :  { %271 = vsyncpa [#allocation6], 1 }
  0xd2   :  { %272 = vsyncpa [#allocation4], 1 }

</bundles_post_ra>
